<compile_context>
chip_gen: v5e
topology: v5e:2x2
jax: 0.10.0
libtpu: 0.0.40
codegen_flags: <defaults>
</compile_context>

<pallas_src>
import functools
import math

import jax
import jax.numpy as jnp
from jax.experimental import pallas as pl
from jax.experimental.pallas import tpu as pltpu


def _vmem():
    return pl.BlockSpec(memory_space=pltpu.MemorySpace.VMEM)


def _smem():
    return pl.BlockSpec(memory_space=pltpu.MemorySpace.SMEM)


# ----------------------------------------------------------------------------
# Kernel 1: backbone stand-in (1x1 conv + ReLU) -> AdaptiveAvgPool2d(1)
# Grid: (batch [parallel], spatial tiles [arbitrary, accumulated]).
# ----------------------------------------------------------------------------
def pool_kernel(x_ref, wconv_ref, bconv_ref, pooled_ref, acc_sc, *, inv_spatial):
    # TODO(synk): the pretrained timm backbone (efficientnet/nfnet/swin) cannot
    # be reproduced in-script; a deterministic 1x1 conv + ReLU stands in for it.
    p = pl.program_id(1)

    @pl.when(p == 0)
    def _():
        acc_sc[...] = jnp.zeros_like(acc_sc)

    x = x_ref[0].astype(jnp.bfloat16)                      # (Cin, TP), lane-dense
    w = wconv_ref[...].astype(jnp.bfloat16)                # (Cfeat, Cin)
    h = jnp.dot(w, x, preferred_element_type=jnp.float32)  # (Cfeat, TP), f32 acc
    h = jnp.maximum(h + bconv_ref[...], 0.0)               # ReLU

    # AdaptiveAvgPool2d(1): accumulate spatial sum for this image.
    acc_sc[...] += jnp.sum(h, axis=1, keepdims=True)       # (Cfeat, 1)

    @pl.when(p == pl.num_programs(1) - 1)
    def _():
        pooled_ref[0] = jnp.transpose(acc_sc[...], (1, 0)) * inv_spatial


# ----------------------------------------------------------------------------
# Kernel 2: Dropout(0.0) -> Linear -> BatchNorm1d (train mode) fused with the
# CurricularFace per-row target quantities and the t-buffer update.
# Single tiny block (B x fc_dim work only).  Scalars travel through SMEM.
# ----------------------------------------------------------------------------
def head_kernel(t_ref, pooled_ref, wfc_ref, bfc_ref, gamma_ref, beta_ref,
                wcol_ref, emb_ref, ctm_ref, ftl_ref, tnew_ref,
                *, cos_m, sin_m, threshold, mm):
    # Dropout(p=0.0) is the identity.
    pooled = pooled_ref[...]                                    # (B, Cfeat) f32
    z = jnp.dot(pooled, wfc_ref[...],
                preferred_element_type=jnp.float32) + bfc_ref[...]

    # BatchNorm1d, training mode: batch mean, biased variance, eps = 1e-5.
    mu = jnp.mean(z, axis=0, keepdims=True)
    var = jnp.mean((z - mu) * (z - mu), axis=0, keepdims=True)
    feat = (z - mu) * jax.lax.rsqrt(var + 1e-5) * gamma_ref[...] + beta_ref[...]

    # l2_norm(embeddings, axis=1) — no epsilon, matching the reference.
    emb = feat * jax.lax.rsqrt(jnp.sum(feat * feat, axis=1, keepdims=True))

    # Gathered label columns of w_face, normalized exactly as
    # l2_norm(kernel, axis=0) would normalize each column.
    wc = wcol_ref[...].astype(jnp.float32)                      # (B, D)
    kc = wc * jax.lax.rsqrt(jnp.sum(wc * wc, axis=1, keepdims=True))

    # target_logit = clamp(cos_theta[i, label[i]], -1, 1)
    tgt = jnp.clip(jnp.sum(emb * kc, axis=1, keepdims=True), -1.0, 1.0)  # (B,1)

    sin_theta = jnp.sqrt(1.0 - tgt * tgt)
    cos_theta_m = tgt * cos_m - sin_theta * sin_m               # cos(theta + m)

    # Buffer update (update-before-mask, matching the reference ordering):
    # t = 0.01 * mean(target_logit) + 0.99 * t
    t_new = jnp.mean(tgt) * 0.01 + (1.0 - 0.01) * t_ref[0, 0]

    final_target = jnp.where(tgt > threshold, cos_theta_m, tgt - mm)

    emb_ref[...] = emb
    ctm_ref[...] = cos_theta_m
    ftl_ref[...] = final_target
    tnew_ref[0, 0] = t_new


# ----------------------------------------------------------------------------
# Kernel 3: class-dimension-tiled CurricularFace logits (HBM-bound streaming
# of bf16 w_face; norm applied AFTER the matmul as a (1, TN) row scale).
# ----------------------------------------------------------------------------
def logits_kernel(emb_ref, w_ref, ctm_ref, tnew_ref, out_ref, *, s):
    w = w_ref[...]                                              # (D, TN) bf16
    # Column sum-of-squares in f32; do NOT materialize a normalized tile.
    w32 = w.astype(jnp.float32)
    inv_norm = jax.lax.rsqrt(jnp.sum(w32 * w32, axis=0, keepdims=True))  # (1,TN)

    emb = emb_ref[...].astype(jnp.bfloat16)                     # (B, D)
    cos_theta = jnp.dot(emb, w, preferred_element_type=jnp.float32) * inv_norm
    cos_theta = jnp.clip(cos_theta, -1.0, 1.0)                  # (B, TN)

    t_new = tnew_ref[0, 0]                                      # scalar from SMEM
    ctm = ctm_ref[...]                                          # (B, 1)
    hard = cos_theta * (t_new + cos_theta)
    out_ref[...] = jnp.where(cos_theta > ctm, hard, cos_theta) * s
    # The label-column overwrite (scatter_ on dim 1) is a tiny host-side
    # post-pass, so no full-width one-hot masking here.


# ----------------------------------------------------------------------------
# Host-side wrapper (layout transforms + pallas_call plumbing only)
# ----------------------------------------------------------------------------
def shopee_curricular_forward(image, label, params, *, margin=0.5, scale=30.0,
                              class_tile=1024, spatial_tile=2048):
    B, c_in, H, W = image.shape
    P = H * W
    c_feat = params["w_conv"].shape[0]
    fc_dim = params["w_fc"].shape[1]
    n_classes = params["w_face"].shape[1]
    label = label.astype(jnp.int32)

    # NCHW -> (B, Cin, H*W): channels on sublanes, spatial lane-dense.  This is
    # a free reshape (H, W are already contiguous).
    x = image.reshape(B, c_in, P)

    # Spatial tiling so one image never has to sit fully in VMEM (v7x 64 MiB).
    tp = spatial_tile if (P > spatial_tile and P % spatial_tile == 0) else P

    # --- pooling pass (backbone stand-in + ReLU + global average pool) -------
    pooled3 = pl.pallas_call(
        functools.partial(pool_kernel, inv_spatial=1.0 / P),
        out_shape=jax.ShapeDtypeStruct((B, 1, c_feat), jnp.float32),
        grid_spec=pltpu.PrefetchScalarGridSpec(
            num_scalar_prefetch=0,
            grid=(B, P // tp),
            in_specs=[
                pl.BlockSpec((1, c_in, tp), lambda b, p: (b, 0, p)),
                pl.BlockSpec((c_feat, c_in), lambda b, p: (0, 0)),
                pl.BlockSpec((c_feat, 1), lambda b, p: (0, 0)),
            ],
            out_specs=pl.BlockSpec((1, 1, c_feat), lambda b, p: (b, 0, 0)),
            scratch_shapes=[pltpu.VMEM((c_feat, 1), jnp.float32)],
        ),
        compiler_params=pltpu.CompilerParams(
            dimension_semantics=("parallel", "arbitrary")),
    )(x, params["w_conv"], params["b_conv"])
    pooled = pooled3.reshape(B, c_feat)

    # --- FC + BN + CurricularFace per-row scalars (fused, single tiny block) --
    cos_m = math.cos(margin)
    sin_m = math.sin(margin)
    threshold = math.cos(math.pi - margin)
    mm = math.sin(math.pi - margin) * margin

    # Gather only the B label columns of w_face on the host (tiny).
    wcol = jnp.take(params["w_face"], label, axis=1).T          # (B, D)

    emb, ctm, ftl, t_new = pl.pallas_call(
        functools.partial(head_kernel, cos_m=cos_m, sin_m=sin_m,
                          threshold=threshold, mm=mm),
        out_shape=(jax.ShapeDtypeStruct((B, fc_dim), jnp.float32),
                   jax.ShapeDtypeStruct((B, 1), jnp.float32),
                   jax.ShapeDtypeStruct((B, 1), jnp.float32),
                   jax.ShapeDtypeStruct((1, 1), jnp.float32)),
        in_specs=[_smem(), _vmem(), _vmem(), _vmem(), _vmem(), _vmem(), _vmem()],
        out_specs=(_vmem(), _vmem(), _vmem(), _smem()),
    )(params["t"], pooled, params["w_fc"], params["b_fc"],
      params["bn_gamma"], params["bn_beta"], wcol)

    # --- class-dim tiled logits ----------------------------------------------
    # Lane-dense class tile: a multiple of 128, capped so toy class counts do
    # not over-pad; for real n_classes (~10k+) this defaults to 1024.
    tn = min(class_tile, pl.cdiv(n_classes, 128) * 128)
    n_pad = pl.cdiv(n_classes, tn) * tn
    w_face = params["w_face"]                                   # (D, N) bf16
    if n_pad > n_classes:
        # ones (not zeros) so padded columns never divide by zero in the norm.
        w_face = jnp.concatenate(
            [w_face, jnp.ones((fc_dim, n_pad - n_classes), w_face.dtype)],
            axis=1)

    logits_pad = pl.pallas_call(
        functools.partial(logits_kernel, s=scale),
        out_shape=jax.ShapeDtypeStruct((B, n_pad), jnp.float32),
        grid_spec=pltpu.PrefetchScalarGridSpec(
            num_scalar_prefetch=0,
            grid=(n_pad // tn,),
            in_specs=[
                pl.BlockSpec((B, fc_dim), lambda j: (0, 0)),
                pl.BlockSpec((fc_dim, tn), lambda j: (0, j)),
                pl.BlockSpec((B, 1), lambda j: (0, 0)),
                pl.BlockSpec(memory_space=pltpu.MemorySpace.SMEM),
            ],
            out_specs=pl.BlockSpec((B, tn), lambda j: (0, j)),
        ),
        compiler_params=pltpu.CompilerParams(
            dimension_semantics=("parallel",)),
    )(emb, w_face, ctm, t_new)

    logits = logits_pad[:, :n_classes]
    # scatter_(1, label, final_target_logit), then * s (scale applied here).
    logits = logits.at[jnp.arange(B), label].set(ftl[:, 0] * scale)
    return logits, t_new


# ----------------------------------------------------------------------------
# Deterministic parameter initialization (mirrors the module's __init__ shapes)
# ----------------------------------------------------------------------------
def init_params(key, *, c_in, c_feat, fc_dim, n_classes):
    k_conv, k_fc, k_face = jax.random.split(key, 3)
    return {
        # backbone stand-in: 1x1 conv weight in (Cout, Cin) layout
        "w_conv": jax.random.normal(k_conv, (c_feat, c_in), jnp.float32) * 0.05,
        "b_conv": jnp.zeros((c_feat, 1), jnp.float32),
        # fc: xavier_normal_, bias = 0
        "w_fc": jax.random.normal(k_fc, (c_feat, fc_dim), jnp.float32)
                * math.sqrt(2.0 / (c_feat + fc_dim)),
        "b_fc": jnp.zeros((1, fc_dim), jnp.float32),
        # bn: weight = 1, bias = 0 (train-mode forward; running stats untouched)
        "bn_gamma": jnp.ones((1, fc_dim), jnp.float32),
        "bn_beta": jnp.zeros((1, fc_dim), jnp.float32),
        # CurricularFace kernel: normal_(std=0.01), stored in bf16 so Pass B
        # streams half the HBM bytes (it dominates total model traffic).
        "w_face": (jax.random.normal(k_face, (fc_dim, n_classes), jnp.float32)
                   * 0.01).astype(jnp.bfloat16),
        # buffer t = 0
        "t": jnp.zeros((1, 1), jnp.float32),
    }


if __name__ == "__main__":
    B, C_IN, H, W = 2, 4, 16, 16
    C_FEAT, FC_DIM, N_CLASSES = 32, 32, 64

    key = jax.random.PRNGKey(0)
    k_img, k_lbl, k_par = jax.random.split(key, 3)

    image = jax.random.normal(k_img, (B, C_IN, H, W), jnp.float32)  # NCHW
    label = jax.random.randint(k_lbl, (B,), 0, N_CLASSES, jnp.int32)
    params = init_params(k_par, c_in=C_IN, c_feat=C_FEAT,
                         fc_dim=FC_DIM, n_classes=N_CLASSES)

    logits, t_new = shopee_curricular_forward(image, label, params,
                                              margin=0.5, scale=30.0)
    jax.block_until_ready(logits)
    jax.block_until_ready(t_new)

    assert logits.shape == (B, N_CLASSES) and logits.dtype == jnp.float32
    assert t_new.shape == (1, 1)
    assert bool(jnp.all(jnp.isfinite(logits)))
    print("KERNEL_OK")
</pallas_src>

<mosaic_0001>
module attributes {stable_mosaic.version = 11 : i64} {
  func.func @pool_kernel(%arg0: i32, %arg1: i32, %arg2: memref<1x4x256xf32, #tpu.memory_space<vmem>>, %arg3: memref<32x4xf32, #tpu.memory_space<vmem>>, %arg4: memref<32x1xf32, #tpu.memory_space<vmem>>, %arg5: memref<1x1x32xf32, #tpu.memory_space<vmem>>, %arg6: memref<32x1xf32, #tpu.memory_space<vmem>>) attributes {dimension_semantics = [#tpu.dimension_semantics<parallel>, #tpu.dimension_semantics<arbitrary>], iteration_bounds = array<i64: 2, 1>, scalar_prefetch = 0 : i64, scratch_operands = 1 : i64, tpu.core_type = #tpu.core_type<tc>, window_params = [{transform_indices = @transform_0, window_bounds = array<i64: 1, 4, 256>}, {pipeline_mode = #tpu.pipeline_mode<synchronous>, transform_indices = @transform_1, window_bounds = array<i64: 32, 4>}, {pipeline_mode = #tpu.pipeline_mode<synchronous>, transform_indices = @transform_2, window_bounds = array<i64: 32, 1>}, {transform_indices = @transform_3, window_bounds = array<i64: 1, 1, 32>}]} {
    %c0_i32 = arith.constant 0 : i32
    %0 = arith.cmpi eq, %arg1, %c0_i32 : i32
    %1 = arith.extui %0 : i1 to i32
    %c0_i32_0 = arith.constant 0 : i32
    %2 = arith.cmpi ne, %1, %c0_i32_0 : i32
    scf.if %2 {
      %cst_15 = arith.constant 0.000000e+00 : f32
      %22 = vector.broadcast %cst_15 : f32 to vector<32x1xf32>
      %c0_16 = arith.constant 0 : index
      %c0_17 = arith.constant 0 : index
      %23 = vector.load %arg6[%c0_16, %c0_17] : memref<32x1xf32, #tpu.memory_space<vmem>>, vector<32x1xf32>
      tpu.vector_store %arg6[%c0_16, %c0_17], %22 {strides = array<i32>} : memref<32x1xf32, #tpu.memory_space<vmem>>, vector<32x1xf32>,
    } else {
    }
    %c0 = arith.constant 0 : index
    %c0_1 = arith.constant 0 : index
    %c0_2 = arith.constant 0 : index
    %3 = vector.load %arg2[%c0, %c0_1, %c0_2] : memref<1x4x256xf32, #tpu.memory_space<vmem>>, vector<1x4x256xf32>
    %4 = vector.shape_cast %3 : vector<1x4x256xf32> to vector<4x256xf32>
    %5 = arith.truncf %4 : vector<4x256xf32> to vector<4x256xbf16>
    %c0_3 = arith.constant 0 : index
    %c0_4 = arith.constant 0 : index
    %6 = vector.load %arg3[%c0_3, %c0_4] : memref<32x4xf32, #tpu.memory_space<vmem>>, vector<32x4xf32>
    %7 = arith.truncf %6 : vector<32x4xf32> to vector<32x4xbf16>
    %cst = arith.constant dense<0.000000e+00> : vector<32x256xf32>
    %8 = tpu.matmul %7, %5, %cst {dimension_numbers = #tpu.dot_dimension_numbers<[1], [0], [0], [1], [0, 0, 1, 1], [], []>} : vector<32x4xbf16>, vector<4x256xbf16>, vector<32x256xf32> -> vector<32x256xf32>
    %c0_5 = arith.constant 0 : index
    %c0_6 = arith.constant 0 : index
    %9 = vector.load %arg4[%c0_5, %c0_6] : memref<32x1xf32, #tpu.memory_space<vmem>>, vector<32x1xf32>
    %10 = vector.broadcast %9 : vector<32x1xf32> to vector<32x256xf32>
    %11 = arith.addf %8, %10 : vector<32x256xf32>
    %cst_7 = arith.constant 0.000000e+00 : f32
    %12 = vector.broadcast %cst_7 : f32 to vector<32x256xf32>
    %13 = arith.maximumf %11, %12 : vector<32x256xf32>
    %c0_8 = arith.constant 0 : index
    %c0_9 = arith.constant 0 : index
    %14 = vector.load %arg6[%c0_8, %c0_9] : memref<32x1xf32, #tpu.memory_space<vmem>>, vector<32x1xf32>
    %cst_10 = arith.constant dense<0.000000e+00> : vector<32xf32>
    %15 = vector.multi_reduction <add>, %13, %cst_10 [1] : vector<32x256xf32> to vector<32xf32>
    %16 = vector.shape_cast %15 : vector<32xf32> to vector<32x1xf32>
    %17 = arith.addf %14, %16 : vector<32x1xf32>
    %c0_11 = arith.constant 0 : index
    %c0_12 = arith.constant 0 : index
    %18 = vector.load %arg6[%c0_11, %c0_12] : memref<32x1xf32, #tpu.memory_space<vmem>>, vector<32x1xf32>
    tpu.vector_store %arg6[%c0_11, %c0_12], %17 {strides = array<i32>} : memref<32x1xf32, #tpu.memory_space<vmem>>, vector<32x1xf32>,
    %c0_i32_13 = arith.constant 0 : i32
    %19 = arith.cmpi eq, %arg1, %c0_i32_13 : i32
    %20 = arith.extui %19 : i1 to i32
    %c0_i32_14 = arith.constant 0 : i32
    %21 = arith.cmpi ne, %20, %c0_i32_14 : i32
    scf.if %21 {
      %c0_15 = arith.constant 0 : index
      %c0_16 = arith.constant 0 : index
      %22 = vector.load %arg6[%c0_15, %c0_16] : memref<32x1xf32, #tpu.memory_space<vmem>>, vector<32x1xf32>
      %23 = tpu.transpose %22, [1, 0] : vector<32x1xf32> -> vector<1x32xf32>
      %cst_17 = arith.constant 3.906250e-03 : f32
      %24 = vector.broadcast %cst_17 : f32 to vector<1x32xf32>
      %25 = arith.mulf %23, %24 : vector<1x32xf32>
      %c0_18 = arith.constant 0 : index
      %c0_19 = arith.constant 0 : index
      %c0_20 = arith.constant 0 : index
      %26 = vector.load %arg5[%c0_18, %c0_19, %c0_20] : memref<1x1x32xf32, #tpu.memory_space<vmem>>, vector<1x1x32xf32>
      %27 = vector.shape_cast %26 : vector<1x1x32xf32> to vector<1x32xf32>
      %28 = vector.shape_cast %25 : vector<1x32xf32> to vector<1x1x32xf32>
      tpu.vector_store %arg5[%c0_18, %c0_19, %c0_20], %28 {strides = array<i32>} : memref<1x1x32xf32, #tpu.memory_space<vmem>>, vector<1x1x32xf32>,
    } else {
    }
    return
  }
  func.func @transform_0(%arg0: i32, %arg1: i32) -> (i32, i32, i32) {
    %c0_i32 = arith.constant 0 : i32
    %c0_i32_0 = arith.constant 0 : i32
    return %arg0, %c0_i32, %arg1 : i32, i32, i32
  }
  func.func @transform_1(%arg0: i32, %arg1: i32) -> (i32, i32) {
    %c0_i32 = arith.constant 0 : i32
    %c0_i32_0 = arith.constant 0 : i32
    %c0_i32_1 = arith.constant 0 : i32
    return %c0_i32, %c0_i32_0 : i32, i32
  }
  func.func @transform_2(%arg0: i32, %arg1: i32) -> (i32, i32) {
    %c0_i32 = arith.constant 0 : i32
    %c0_i32_0 = arith.constant 0 : i32
    %c0_i32_1 = arith.constant 0 : i32
    return %c0_i32, %c0_i32_0 : i32, i32
  }
  func.func @transform_3(%arg0: i32, %arg1: i32) -> (i32, i32, i32) {
    %c0_i32 = arith.constant 0 : i32
    %c0_i32_0 = arith.constant 0 : i32
    %c0_i32_1 = arith.constant 0 : i32
    return %arg0, %c0_i32, %c0_i32_0 : i32, i32, i32
  }
}

</mosaic_0001>

<bundles_post_ra>
// kernel: tpu_custom_call.1
= control target key start
LH: loop header
LB: loop body
LE: loop exit
PB: predicated region body
PF: predicated region fallthrough
CT: control target
= control target key end

     0   :  { %8 = vsyncpa [#allocation4], 0  ;;  %s760_s0 = inlined_call_operand.vmem [shape: f32[2,4,256], index: 0, kind: input, shape index: {}]   ;;  %s761_s1 = inlined_call_operand.vmem [shape: f32[32,4], index: 1, kind: input, shape index: {}]   ;;  %s762_s2 = inlined_call_operand.vmem [shape: f32[32,1], index: 2, kind: input, shape index: {}]   ;;  %s763_s3 = inlined_call_operand.hbm [shape: f32[2,1,32], index: 3, kind: output, shape index: {}]  }
   0x1   :  { %10 = vsyncpa [#allocation4 + $0x1], 0  ;;  %s631_s12 = smov 0   ;;  %s633_s13 = smov 0  }
   0x2   :  { %s635_s14 = smov 0   ;;  %s637_s15 = smov 0  }
   0x3   :  { %s639_s16 = smov 0   ;;  %s641_s17 = smov 0  }
   0x4 LB: > { %s454_s18 = sadd.s32 4294967295, %s607_s17   ;;  %s455_s19 = sadd.s32 4294967294, %s607_s17   ;;  %s607_s17 = sphi %s641_s17, %s16_s17   ;;  %s603_s16 = sphi %s639_s16, %s770_s16   ;;  %s599_s15 = sphi %s637_s15, %s769_s15   ;;  %s595_s14 = sphi %s635_s14, %s768_s14   ;;  %s591_s13 = sphi %s633_s13, %s767_s13   ;;  %s587_s12 = sphi %s631_s12, %s766_s12  }
   0x5   : > { %s28_s20 = sadd.s32 1, %s603_s16  ;;  %s105_s21 = sadd.s32 1, %s595_s14 }
   0x6   : > { %p30_p0 = scmp.ge.s32.totalorder %s28_s20, 2  ;;  %p115_p1 = scmp.ne.s32.totalorder %s595_s14, %s591_s13 }
   0x7   : > { %p116_p2 = scmp.eq.s32.totalorder %s454_s18, 1  ;;  %p121_p3 = scmp.ne.s32.totalorder %s591_s13, %s587_s12 }
   0x8   : > { %s772_s20 = smov (%p30_p0, %s28_s20), 0  ;;  %p122_p5 = scmp.eq.s32.totalorder %s455_s19, 1 }
   0x9   : > { %p671_p4 = por %p116_p2, %p115_p1  ;;  %s102_s23 = ssub.s32 %s603_s16, %s772_s20 }
   0xa   : > { %p458_p6 = scmp.ge.s32.totalorder %s607_s17, 1  ;;  %p103_p7 = scmp.eq.s32.totalorder %s102_s23, 0 }
   0xb   : > { %p678_p8 = por %p122_p5, %p121_p3  ;;  %p159_p9 = scmp.lt.s32.totalorder %s607_s17, 3 }
   0xc   : > { %s684_s25 = scalar_select %p103_p7, %s595_s14, %s105_s21  }
   0xd   : > { %p160_p10 = pnand %p458_p6, %p159_p9 }
   0xe   : > { %p187_p11 = scmp.lt.s32.totalorder (!%p160_p10), %s599_s15, 1  ;;  %s184_s30 = sand.u32 (!%p160_p10), 1, %s591_s13  }
   0xf   : > { %163 = sbr.rel (%p160_p10) target bundleno = 456 (0x1c8), region = 32  ;;  %s381_s6 = scalar_lea.hbm (!%p160_p10), %s763_s3, %s599_s15 }
  0x10   : > { %s385_s9 = sshll.u32 (!%p160_p10), %s381_s6, 4  ;;  %s373_s10 = scalar_lea.sflag (!%p160_p10), [#allocation4], %s184_s30  ;;  %s386_s9 = int_to_ptr.hbm [resolvable:$true] %s385_s9 }
  0x11   : > { %s543_s11 = sshra.s32 (!%p160_p10), %s386_s9, 4  ;;  %s544_s11 = int_to_ptr.hbm [resolvable:$true] %s543_s11 }
  0x12   : > { %s545_s18 = scalar_lea.hbm (!%p160_p10), %s544_s11, 1  ;;  %p550_p1 = scmp.lt.s32.totalorder (!%p160_p10), %s544_s11, %s763_s3 }
  0x13   : > { %p546_p12 = scmp.ne.s32.totalorder (!%p160_p10), %s544_s11, %s545_s18 }
  0x14   : > { %v609_v0 = vmov 0   ;;  %v221_v1 = vld [vmem:[%s762_s2] sm:$0xff]  ;;  %s188_s28 = scalar_select %p187_p11, %s599_s15, 1  ;;  %v223_v2 = vld [vmem:[%s762_s2 + $0x10] sm:$0xff]  ;;  %v222_v4 = vld [vmem:[%s762_s2 + $0x8] sm:$0xff]  ;;  %vm252_vm0 = vcmask 1041408  }
  0x15   : > { %527 = vset.pattern.permute.xlu0 %v609_v0  ;;  %528 = vset.pattern.permute.xlu1 %v609_v0  ;;  %v224_v5 = vld [vmem:[%s762_s2 + $0x18] sm:$0xff]  ;;  %v215_v6 = vld [vmem:[%s761_s1] sm:$0xff]  ;;  %v216_v7 = vld [vmem:[%s761_s1 + $0x8] sm:$0xff]  ;;  %vm245_vm1 = vcmask 31744   ;;  %vm201_vm2 = vcmask 7168   ;;  %v610_v18 = vmov 0.0   ;;  %p547_p13 = pnand %p546_p12, %p671_p4 }
  0x16   : > { %227 = vperm.xlu0 %527, %v221_v1   ;;  %237 = vperm.xlu1 %528, %v223_v2   ;;  %s467_s4 = sshll.u32 %s188_s28, 3  ;;  %v217_v12 = vld [vmem:[%s761_s1 + $0x10] sm:$0xff]  ;;  %v218_v13 = vld [vmem:[%s761_s1 + $0x18] sm:$0xff]  ;;  %v219_v16 = vpack.c.bf16 %v216_v7, %v215_v6  ;;  %202 = vst.msk [vmem:[#allocation2] sm:$0xff] %vm201_vm2, %v610_v18  ;;  %vm370_vm3 = vcmask 253952   ;;  %s549_s15 = scalar_lea.hbm %s763_s3, 2 }
  0x17   : > { %s194_s7 = scalar_lea.vmem %s760_s0, %s467_s4  ;;  %v220_v17 = vpack.c.bf16 %v218_v13, %v217_v12  ;;  %203 = vst.msk [vmem:[#allocation2 + $0x8] sm:$0xff] %vm201_vm2, %v610_v18  ;;  %p548_p0 = pneg %p547_p13 }
  0x18   : > { %v206_v3 = vld [vmem:[%s194_s7] sm:$0xff]  ;;  %204 = vst.msk [vmem:[#allocation2 + $0x10] sm:$0xff] %vm201_vm2, %v610_v18  ;;  %s185_s7 = scalar_lea.vmem [#allocation3], %s184_s30  ;;  %p551_p2 = scmp.lt.s32.totalorder %s549_s15, %s545_s18 }
  0x19   : > { %208 = vst [vmem:[#allocation1] ss:$2 sm:$0xff] %v206_v3  ;;  %s383_s8 = sshll.u32 %s185_s7, 4  ;;  %s384_s8 = int_to_ptr.vmem [resolvable:$true] %s383_s8 }
  0x1a   : > { %205 = vst.msk [vmem:[#allocation2 + $0x18] sm:$0xff] %vm201_vm2, %v610_v18  ;;  %p552_p3 = por %p551_p2, %p550_p1 }
  0x1c   : > { %p553_p5 = pnand %p552_p3, %p548_p0 }
  0x1d   : > { %v305_v51 = vld [vmem:[#allocation2] sm:$0xff] }
  0x1e   : > { %232 = vperm.xlu0 %527, %v222_v4   ;;  %242 = vperm.xlu1 %528, %v224_v5   ;;  %v306_v55 = vld [vmem:[#allocation2 + $0x8] sm:$0xff] }
  0x1f   : > { %v307_v54 = vld [vmem:[#allocation2 + $0x10] sm:$0xff] }
  0x20   : > { %v209_v8 = vld.sshfl [vmem:[#allocation1] sm:$0xff pattern:$0x75316420]  ;;  %v210_v9 = vld.sshfl [vmem:[#allocation1 + $0x8] sm:$0xff pattern:$0x75316420] }
  0x21   : > { %v213_v10 = vpack.c.bf16 %v209_v8, %v209_v8  ;;  %v214_v11 = vpack.c.bf16 %v210_v9, %v210_v9  ;;  %v308_v61 = vld [vmem:[#allocation2 + $0x18] sm:$0xff] }
  0x23   : > { %v254_v14 = vsel %vm252_vm0, %v213_v10, 0  ;;  %v257_v15 = vsel %vm252_vm0, %v214_v11, 0 }
  0x24   : > { %266 = vmatpush.bf16.msra.mxu0 %v254_v14  ;;  %285 = vmatpush.bf16.msra.mxu1 %v257_v15 }
  0x25   : > { %468 = vmatpush.bf16.msra.mxu2 %v254_v14  ;;  %469 = vmatpush.bf16.msra.mxu3 %v257_v15 }
  0x27   : > { %461 = vmatmul.msk.bf16.vlgmr.msra.gmra.mxu0 %vm245_vm1, %v219_v16  ;;  %463 = vmatmul.msk.bf16.vlgmr.msra.gmra.mxu1 %vm245_vm1, %v219_v16 }
  0x28   : > { %462 = vmatmul.msk.bf16.vlgmr.msra.gmra.mxu2 %vm245_vm1, %v220_v17  ;;  %464 = vmatmul.msk.bf16.vlgmr.msra.gmra.mxu3 %vm245_vm1, %v220_v17 }
  0x88   : > { %v228_v19 = vpop.permute.xlu0 %227  ;;  %v238_v26 = vpop.permute.xlu1 %237 }
  0x90   : > { %v233_v28 = vpop.permute.xlu0 %232  ;;  %v243_v43 = vpop.permute.xlu1 %242 }
  0xa4   : > { %v268_v20 = vpop.f32.mrf.mxu0  ;;  %v287_v21 = vpop.f32.mrf.mxu1 }
  0xa5   : > { %v269_v22 = vadd.f32 %v268_v20, %v228_v19  ;;  %v288_v23 = vadd.f32 %v287_v21, %v228_v19 }
  0xa7   : > { %v297_v24 = vmax.f32 %v269_v22, 0.0  ;;  %v298_v25 = vmax.f32 %v288_v23, 0.0 }
  0xa9   : > { %v309_v27 = vadd.f32 %v298_v25, %v297_v24 }
  0xab   : > { %310 = vadd.xlane.f32.xlu2 %v309_v27  ;;  %v273_v29 = vpop.f32.mrf.mxu2  ;;  %v292_v30 = vpop.f32.mrf.mxu3 }
  0xac   : > { %v270_v31 = vpop.f32.mrf.mxu0  ;;  %v274_v32 = vadd.f32 %v273_v29, %v238_v26  ;;  %v289_v33 = vpop.f32.mrf.mxu1  ;;  %v293_v34 = vadd.f32 %v292_v30, %v238_v26 }
  0xad   : > { %v271_v35 = vadd.f32 %v270_v31, %v233_v28  ;;  %v290_v36 = vadd.f32 %v289_v33, %v233_v28 }
  0xae   : > { %v301_v37 = vmax.f32 %v274_v32, 0.0  ;;  %v302_v38 = vmax.f32 %v293_v34, 0.0 }
  0xaf   : > { %v299_v39 = vmax.f32 %v271_v35, 0.0  ;;  %v300_v40 = vmax.f32 %v290_v36, 0.0 }
  0xb0   : > { %v315_v41 = vadd.f32 %v302_v38, %v301_v37 }
  0xb1   : > { %v312_v42 = vadd.f32 %v300_v40, %v299_v39 }
  0xb2   : > { %316 = vadd.xlane.f32.xlu0 %v315_v41 }
  0xb3   : > { %313 = vadd.xlane.f32.xlu2 %v312_v42  ;;  %v275_v44 = vpop.f32.mrf.mxu2  ;;  %v294_v45 = vpop.f32.mrf.mxu3 }
  0xb4   : > { %v276_v46 = vadd.f32 %v275_v44, %v243_v43  ;;  %v295_v47 = vadd.f32 %v294_v45, %v243_v43 }
  0xb6   : > { %v303_v48 = vmax.f32 %v276_v46, 0.0  ;;  %v304_v49 = vmax.f32 %v295_v47, 0.0 }
  0xb8   : > { %v318_v50 = vadd.f32 %v304_v49, %v303_v48 }
  0xba   : > { %319 = vadd.xlane.f32.xlu1 %v318_v50 }
 0x11e   : > { %v311_v52 = vpop.xlane.xlu2 %310 }
 0x11f   : > { %v321_v53 = vadd.f32 %v311_v52, %v305_v51 }
 0x121   : > { %326 = vst.msk [vmem:[#allocation2] sm:$0xff] %vm201_vm2, %v321_v53 }
 0x125   : > { %v317_v56 = vpop.xlane.xlu0 %316 }
 0x126   : > { %v314_v57 = vpop.xlane.xlu2 %313  ;;  %v323_v58 = vadd.f32 %v317_v56, %v307_v54 }
 0x127   : > { %v322_v59 = vadd.f32 %v314_v57, %v306_v55 }
 0x128   : > { %v333_v60 = vld [vmem:[#allocation2] sm:$0xff]  ;;  %328 = vst.msk [vmem:[#allocation2 + $0x10] sm:$0xff] %vm201_vm2, %v323_v58 }
 0x129   : > { %327 = vst.msk [vmem:[#allocation2 + $0x8] sm:$0xff] %vm201_vm2, %v322_v59  ;;  %337 = vxpose.xlu2.b32.start [1/4] (short) (narrow) %v333_v60, 8 }
 0x12d   : > { %v320_v62 = vpop.xlane.xlu1 %319 }
 0x12e   : > { %v324_v63 = vadd.f32 %v320_v62, %v308_v61 }
 0x12f   : > { %v335_v1 = vld [vmem:[#allocation2 + $0x10] sm:$0xff] }
 0x130   : > { %329 = vst.msk [vmem:[#allocation2 + $0x18] sm:$0xff] %vm201_vm2, %v324_v63  ;;  %v334_v0 = vld [vmem:[#allocation2 + $0x8] sm:$0xff] }
 0x131   : > { %338 = vxpose.xlu2.b32.cont [2/4] (short) (narrow) %v334_v0, 8 }
 0x137   : > { %v336_v2 = vld [vmem:[#allocation2 + $0x18] sm:$0xff] }
 0x139   : > { %339 = vxpose.xlu2.b32.cont [3/4] (short) (narrow) %v335_v1, 8 }
 0x141   : > { %340 = vxpose.xlu2.b32.end [4/4] (short) (narrow) %v336_v2, 8 }
 0x1c2   : > { %v353_v3 = vpop.trf.xlu2 }
 0x1c3   : > { %v369_v4 = vmul.f32 0.00390625, %v353_v3 }
 0x1c5   : > { %371 = vst.msk [vmem:[%s185_s7] sm:$0x1] %vm370_vm3, %v369_v4 }
 0x1c6   : > { %556 = shalt.err (!%p553_p5)
}
 0x1c7   : > { %470 = dma.vmem_to_hbm [thread:$0]  (%p671_p4), %s384_s8, 16, %s386_s9, %s373_s10  }
 0x1c8 PF: > { %p476_p6 = scmp.ge.s32.totalorder %s607_s17, 2  ;;  %s397_s27 = sand.u32 1, %s587_s12  }
 0x1c9   : > { %s398_s28 = scalar_lea.sflag [#allocation4], %s397_s27 }
 0x1ca   : > { %p473_p7 = pnand %p476_p6, %p678_p8 }
 0x1cc   : > { %p474_p9 = pneg %p473_p7 }
 0x1ce   : > { %582 = dma.done.wait (%p474_p9), %s398_s28, 16  }
 0x1cf   : > { %584 = vsyncadd (%p474_p9), %s398_s28, 4294967280  ;;  %s16_s17 = sadd.s32 1, %s607_s17   ;;  %s766_s12 = smov %s591_s13 }
 0x1d0   : > { %p13_p10 = scmp.ge.s32.totalorder %s16_s17, 4   ;;  %s767_s13 = smov %s595_s14 }
 0x1d1   : > { %s768_s14 = smov %s684_s25  ;;  %s769_s15 = smov %s603_s16 }
 0x1d2   : > { %s770_s16 = smov %s772_s20  ;;  %15 = sbr.rel (!%p13_p10) target bundleno = 4 (0x4), region = 75 }
 0x1d7   :  { %403 = vsyncpa [#allocation4], 1 }
 0x1d8   :  { %405 = vsyncpa [#allocation4 + $0x1], 1 }

</bundles_post_ra>
